<compile_context>
chip_gen: v7x
topology: tpu7x:2x2x1
jax: 0.10.0
libtpu: 0.0.40
codegen_flags: <defaults>
</compile_context>

<pallas_src>
import jax
import jax.numpy as jnp
from jax.experimental import pallas as pl
from jax.experimental.pallas import tpu as pltpu

LANE = 128
SUBLANE = 8


def _round_up(n, m):
    return ((n + m - 1) // m) * m


def _mlp_kernel(x_ref,
                w_in_ref, b_in_ref,
                w_h1_ref, b_h1_ref,
                w_h2_ref, b_h2_ref,
                w_out_ref, b_out_ref,
                o_ref):
    # input_layer + tanh
    h = jnp.tanh(
        jnp.dot(x_ref[...], w_in_ref[...], preferred_element_type=jnp.float32)
        + b_in_ref[...])
    # hidden_layer1 applied twice, tanh after each (matches `for i in range(2)`)
    h = jnp.tanh(
        jnp.dot(h, w_h1_ref[...], preferred_element_type=jnp.float32)
        + b_h1_ref[...])
    h = jnp.tanh(
        jnp.dot(h, w_h1_ref[...], preferred_element_type=jnp.float32)
        + b_h1_ref[...])
    # hidden_layer2 (no activation) -> phi
    phi = (jnp.dot(h, w_h2_ref[...], preferred_element_type=jnp.float32)
           + b_h2_ref[...])
    # output_layer (no activation)
    o_ref[...] = (
        jnp.dot(phi, w_out_ref[...], preferred_element_type=jnp.float32)
        + b_out_ref[...]).astype(o_ref.dtype)


def prepare_params(params):
    """One-time prep (call once, reuse every forward): transpose PyTorch-style
    [out, in] weights to [in, out] and zero-pad the feature dims (H, D, D_out) to
    multiples of 128 lanes.  Zero padding is exact: padded hidden columns stay
    tanh(0 + 0) = 0 / 0 through every layer and padded output columns are sliced
    off in the wrapper.  D_in stays unpadded so x needs no per-call padding."""
    w_in, b_in = params["input_layer"]       # [H, D_in], [H]
    w_h1, b_h1 = params["hidden_layer1"]     # [H, H],    [H]
    w_h2, b_h2 = params["hidden_layer2"]     # [D, H],    [D]
    w_out, b_out = params["output_layer"]    # [D_out, D],[D_out]

    H, D_in = w_in.shape
    D = w_h2.shape[0]
    D_out = w_out.shape[0]
    Hp = _round_up(H, LANE)
    Dp = _round_up(D, LANE)
    Op = _round_up(D_out, LANE)

    def pad2(a, rows, cols):
        return jnp.pad(a, ((0, rows - a.shape[0]), (0, cols - a.shape[1])))

    def pad_bias(b, cols):
        return jnp.pad(b.reshape(1, -1), ((0, 0), (0, cols - b.shape[0])))

    args = (
        pad2(w_in.T, D_in, Hp), pad_bias(b_in, Hp),
        pad2(w_h1.T, Hp, Hp),   pad_bias(b_h1, Hp),
        pad2(w_h2.T, Hp, Dp),   pad_bias(b_h2, Dp),
        pad2(w_out.T, Dp, Op),  pad_bias(b_out, Op),
    )
    return {"args": tuple(jax.device_put(a) for a in args), "d_out": D_out}


def neural_net_forward(x, prepped, *, tile_n=512):
    """x: [N, D_in] float32; prepped: output of prepare_params (weights already
    transposed / lane-padded and living on device)."""
    (w_in_p, b_in_p, w_h1_p, b_h1_p,
     w_h2_p, b_h2_p, w_out_p, b_out_p) = prepped["args"]
    d_out = prepped["d_out"]

    N, d_in = x.shape
    assert d_in == w_in_p.shape[0], "x feature dim mismatch"
    hp = w_in_p.shape[1]
    dp = w_h2_p.shape[1]
    op = w_out_p.shape[1]

    # Batch tile: multiple of 8 sublanes, no larger than the (rounded) batch.
    tile_n = max(SUBLANE, min(tile_n, _round_up(N, SUBLANE)))
    tile_n = _round_up(tile_n, SUBLANE)
    n_pad = _round_up(N, tile_n)
    if n_pad != N:
        x = jnp.pad(x, ((0, n_pad - N), (0, 0)))

    grid = (n_pad // tile_n,)

    def resident(shape):
        # Same block every grid step -> stays VMEM-resident (no re-DMA).
        return pl.BlockSpec(shape, lambda i: (0, 0))

    in_specs = [
        pl.BlockSpec((tile_n, d_in), lambda i: (i, 0)),   # streamed x tiles
        resident(w_in_p.shape), resident(b_in_p.shape),
        resident(w_h1_p.shape), resident(b_h1_p.shape),
        resident(w_h2_p.shape), resident(b_h2_p.shape),
        resident(w_out_p.shape), resident(b_out_p.shape),
    ]
    # Lane-dense output (op % 128 == 0) -> unmasked stores.
    out_spec = pl.BlockSpec((tile_n, op), lambda i: (i, 0))

    flops = 2 * n_pad * (d_in * hp + 2 * hp * hp + hp * dp + dp * op)
    weight_bytes = sum(int(a.size) * a.dtype.itemsize for a in prepped["args"])
    cost = pl.CostEstimate(
        flops=int(flops),
        transcendentals=int(3 * n_pad * hp),
        bytes_accessed=int(x.size) * x.dtype.itemsize + n_pad * op * 4 + weight_bytes,
    )

    out = pl.pallas_call(
        _mlp_kernel,
        out_shape=jax.ShapeDtypeStruct((n_pad, op), jnp.float32),
        grid=grid,
        in_specs=in_specs,
        out_specs=out_spec,
        compiler_params=pltpu.CompilerParams(
            dimension_semantics=("parallel",)),   # shards grid across TCs on v7x
        cost_estimate=cost,
    )(x, *prepped["args"])

    # Strip batch + lane padding (cheap static slices).
    return out[:N, :d_out]


def _init_linear(key, out_features, in_features):
    """Deterministic PyTorch-Linear-style init: U(-1/sqrt(fan_in), 1/sqrt(fan_in))."""
    kw, kb = jax.random.split(key)
    bound = 1.0 / jnp.sqrt(jnp.float32(in_features))
    w = jax.random.uniform(kw, (out_features, in_features), jnp.float32, -bound, bound)
    b = jax.random.uniform(kb, (out_features,), jnp.float32, -bound, bound)
    return w, b


def _reference_forward(x, params):
    (w_in, b_in) = params["input_layer"]
    (w_h1, b_h1) = params["hidden_layer1"]
    (w_h2, b_h2) = params["hidden_layer2"]
    (w_out, b_out) = params["output_layer"]
    h = jnp.tanh(x @ w_in.T + b_in)
    for _ in range(2):
        h = jnp.tanh(h @ w_h1.T + b_h1)
    phi = h @ w_h2.T + b_h2
    return phi @ w_out.T + b_out


if __name__ == "__main__":
    # Small shapes consistent with the module: x is [N, D_in].
    N, D_in, H, D, D_out = 8, 32, 32, 32, 16

    root = jax.random.PRNGKey(0)
    kx, k1, k2, k3, k4 = jax.random.split(root, 5)

    x = jax.random.normal(kx, (N, D_in), jnp.float32)
    params = {
        "input_layer": _init_linear(k1, H, D_in),
        "hidden_layer1": _init_linear(k2, H, H),
        "hidden_layer2": _init_linear(k3, D, H),
        "output_layer": _init_linear(k4, D_out, D),
    }

    # One-time weight prep (transpose + lane-pad), reused across forward calls.
    prepped = prepare_params(params)

    y = jax.block_until_ready(neural_net_forward(x, prepped))
    y_ref = _reference_forward(x, params)
    assert y.shape == (N, D_out)
    assert jnp.allclose(y, y_ref, atol=1e-5, rtol=1e-5)

    # Also exercise the multi-tile / batch-padding path (N not a tile multiple).
    x2 = jax.random.normal(jax.random.PRNGKey(1), (20, D_in), jnp.float32)
    y2 = jax.block_until_ready(neural_net_forward(x2, prepped, tile_n=16))
    assert y2.shape == (20, D_out)
    assert jnp.allclose(y2, _reference_forward(x2, params), atol=1e-5, rtol=1e-5)

    print("KERNEL_OK")
</pallas_src>

<mosaic_0001>
module attributes {stable_mosaic.version = 11 : i64} {
  func.func @_mlp_kernel(%arg0: i32, %arg1: memref<8x32xf32, #tpu.memory_space<vmem>>, %arg2: memref<32x128xf32, #tpu.memory_space<vmem>>, %arg3: memref<1x128xf32, #tpu.memory_space<vmem>>, %arg4: memref<128x128xf32, #tpu.memory_space<vmem>>, %arg5: memref<1x128xf32, #tpu.memory_space<vmem>>, %arg6: memref<128x128xf32, #tpu.memory_space<vmem>>, %arg7: memref<1x128xf32, #tpu.memory_space<vmem>>, %arg8: memref<128x128xf32, #tpu.memory_space<vmem>>, %arg9: memref<1x128xf32, #tpu.memory_space<vmem>>, %arg10: memref<8x128xf32, #tpu.memory_space<vmem>>) attributes {dimension_semantics = [#tpu.dimension_semantics<parallel>], iteration_bounds = array<i64: 1>, scalar_prefetch = 0 : i64, scratch_operands = 0 : i64, tpu.core_type = #tpu.core_type<tc>, window_params = [{transform_indices = @transform_0, window_bounds = array<i64: 8, 32>}, {pipeline_mode = #tpu.pipeline_mode<synchronous>, transform_indices = @transform_1, window_bounds = array<i64: 32, 128>}, {pipeline_mode = #tpu.pipeline_mode<synchronous>, transform_indices = @transform_2, window_bounds = array<i64: 1, 128>}, {pipeline_mode = #tpu.pipeline_mode<synchronous>, transform_indices = @transform_3, window_bounds = array<i64: 128, 128>}, {pipeline_mode = #tpu.pipeline_mode<synchronous>, transform_indices = @transform_4, window_bounds = array<i64: 1, 128>}, {pipeline_mode = #tpu.pipeline_mode<synchronous>, transform_indices = @transform_5, window_bounds = array<i64: 128, 128>}, {pipeline_mode = #tpu.pipeline_mode<synchronous>, transform_indices = @transform_6, window_bounds = array<i64: 1, 128>}, {pipeline_mode = #tpu.pipeline_mode<synchronous>, transform_indices = @transform_7, window_bounds = array<i64: 128, 128>}, {pipeline_mode = #tpu.pipeline_mode<synchronous>, transform_indices = @transform_8, window_bounds = array<i64: 1, 128>}, {transform_indices = @transform_9, window_bounds = array<i64: 8, 128>}]} {
    %c0 = arith.constant 0 : index
    %c0_0 = arith.constant 0 : index
    %0 = vector.load %arg1[%c0, %c0_0] : memref<8x32xf32, #tpu.memory_space<vmem>>, vector<8x32xf32>
    %c0_1 = arith.constant 0 : index
    %c0_2 = arith.constant 0 : index
    %1 = vector.load %arg2[%c0_1, %c0_2] : memref<32x128xf32, #tpu.memory_space<vmem>>, vector<32x128xf32>
    %cst = arith.constant dense<0.000000e+00> : vector<8x128xf32>
    %2 = tpu.matmul %0, %1, %cst {dimension_numbers = #tpu.dot_dimension_numbers<[1], [0], [0], [1], [0, 0, 1, 1], [], []>} : vector<8x32xf32>, vector<32x128xf32>, vector<8x128xf32> -> vector<8x128xf32>
    %c0_3 = arith.constant 0 : index
    %c0_4 = arith.constant 0 : index
    %3 = vector.load %arg3[%c0_3, %c0_4] : memref<1x128xf32, #tpu.memory_space<vmem>>, vector<1x128xf32>
    %4 = vector.broadcast %3 : vector<1x128xf32> to vector<8x128xf32>
    %5 = arith.addf %2, %4 : vector<8x128xf32>
    %6 = math.tanh %5 : vector<8x128xf32>
    %c0_5 = arith.constant 0 : index
    %c0_6 = arith.constant 0 : index
    %7 = vector.load %arg4[%c0_5, %c0_6] : memref<128x128xf32, #tpu.memory_space<vmem>>, vector<128x128xf32>
    %cst_7 = arith.constant dense<0.000000e+00> : vector<8x128xf32>
    %8 = tpu.matmul %6, %7, %cst_7 {dimension_numbers = #tpu.dot_dimension_numbers<[1], [0], [0], [1], [0, 0, 1, 1], [], []>} : vector<8x128xf32>, vector<128x128xf32>, vector<8x128xf32> -> vector<8x128xf32>
    %c0_8 = arith.constant 0 : index
    %c0_9 = arith.constant 0 : index
    %9 = vector.load %arg5[%c0_8, %c0_9] : memref<1x128xf32, #tpu.memory_space<vmem>>, vector<1x128xf32>
    %10 = vector.broadcast %9 : vector<1x128xf32> to vector<8x128xf32>
    %11 = arith.addf %8, %10 : vector<8x128xf32>
    %12 = math.tanh %11 : vector<8x128xf32>
    %c0_10 = arith.constant 0 : index
    %c0_11 = arith.constant 0 : index
    %13 = vector.load %arg4[%c0_10, %c0_11] : memref<128x128xf32, #tpu.memory_space<vmem>>, vector<128x128xf32>
    %cst_12 = arith.constant dense<0.000000e+00> : vector<8x128xf32>
    %14 = tpu.matmul %12, %13, %cst_12 {dimension_numbers = #tpu.dot_dimension_numbers<[1], [0], [0], [1], [0, 0, 1, 1], [], []>} : vector<8x128xf32>, vector<128x128xf32>, vector<8x128xf32> -> vector<8x128xf32>
    %c0_13 = arith.constant 0 : index
    %c0_14 = arith.constant 0 : index
    %15 = vector.load %arg5[%c0_13, %c0_14] : memref<1x128xf32, #tpu.memory_space<vmem>>, vector<1x128xf32>
    %16 = vector.broadcast %15 : vector<1x128xf32> to vector<8x128xf32>
    %17 = arith.addf %14, %16 : vector<8x128xf32>
    %18 = math.tanh %17 : vector<8x128xf32>
    %c0_15 = arith.constant 0 : index
    %c0_16 = arith.constant 0 : index
    %19 = vector.load %arg6[%c0_15, %c0_16] : memref<128x128xf32, #tpu.memory_space<vmem>>, vector<128x128xf32>
    %cst_17 = arith.constant dense<0.000000e+00> : vector<8x128xf32>
    %20 = tpu.matmul %18, %19, %cst_17 {dimension_numbers = #tpu.dot_dimension_numbers<[1], [0], [0], [1], [0, 0, 1, 1], [], []>} : vector<8x128xf32>, vector<128x128xf32>, vector<8x128xf32> -> vector<8x128xf32>
    %c0_18 = arith.constant 0 : index
    %c0_19 = arith.constant 0 : index
    %21 = vector.load %arg7[%c0_18, %c0_19] : memref<1x128xf32, #tpu.memory_space<vmem>>, vector<1x128xf32>
    %22 = vector.broadcast %21 : vector<1x128xf32> to vector<8x128xf32>
    %23 = arith.addf %20, %22 : vector<8x128xf32>
    %c0_20 = arith.constant 0 : index
    %c0_21 = arith.constant 0 : index
    %24 = vector.load %arg8[%c0_20, %c0_21] : memref<128x128xf32, #tpu.memory_space<vmem>>, vector<128x128xf32>
    %cst_22 = arith.constant dense<0.000000e+00> : vector<8x128xf32>
    %25 = tpu.matmul %23, %24, %cst_22 {dimension_numbers = #tpu.dot_dimension_numbers<[1], [0], [0], [1], [0, 0, 1, 1], [], []>} : vector<8x128xf32>, vector<128x128xf32>, vector<8x128xf32> -> vector<8x128xf32>
    %c0_23 = arith.constant 0 : index
    %c0_24 = arith.constant 0 : index
    %26 = vector.load %arg9[%c0_23, %c0_24] : memref<1x128xf32, #tpu.memory_space<vmem>>, vector<1x128xf32>
    %27 = vector.broadcast %26 : vector<1x128xf32> to vector<8x128xf32>
    %28 = arith.addf %25, %27 : vector<8x128xf32>
    %c0_25 = arith.constant 0 : index
    %c0_26 = arith.constant 0 : index
    %29 = vector.load %arg10[%c0_25, %c0_26] : memref<8x128xf32, #tpu.memory_space<vmem>>, vector<8x128xf32>
    tpu.vector_store %arg10[%c0_25, %c0_26], %28 {strides = array<i32>} : memref<8x128xf32, #tpu.memory_space<vmem>>, vector<8x128xf32>,
    return
  }
  func.func @transform_0(%arg0: i32) -> (i32, i32) {
    %c0_i32 = arith.constant 0 : i32
    %c0_i32_0 = arith.constant 0 : i32
    return %arg0, %c0_i32 : i32, i32
  }
  func.func @transform_1(%arg0: i32) -> (i32, i32) {
    %c0_i32 = arith.constant 0 : i32
    %c0_i32_0 = arith.constant 0 : i32
    %c0_i32_1 = arith.constant 0 : i32
    return %c0_i32, %c0_i32_0 : i32, i32
  }
  func.func @transform_2(%arg0: i32) -> (i32, i32) {
    %c0_i32 = arith.constant 0 : i32
    %c0_i32_0 = arith.constant 0 : i32
    %c0_i32_1 = arith.constant 0 : i32
    return %c0_i32, %c0_i32_0 : i32, i32
  }
  func.func @transform_3(%arg0: i32) -> (i32, i32) {
    %c0_i32 = arith.constant 0 : i32
    %c0_i32_0 = arith.constant 0 : i32
    %c0_i32_1 = arith.constant 0 : i32
    return %c0_i32, %c0_i32_0 : i32, i32
  }
  func.func @transform_4(%arg0: i32) -> (i32, i32) {
    %c0_i32 = arith.constant 0 : i32
    %c0_i32_0 = arith.constant 0 : i32
    %c0_i32_1 = arith.constant 0 : i32
    return %c0_i32, %c0_i32_0 : i32, i32
  }
  func.func @transform_5(%arg0: i32) -> (i32, i32) {
    %c0_i32 = arith.constant 0 : i32
    %c0_i32_0 = arith.constant 0 : i32
    %c0_i32_1 = arith.constant 0 : i32
    return %c0_i32, %c0_i32_0 : i32, i32
  }
  func.func @transform_6(%arg0: i32) -> (i32, i32) {
    %c0_i32 = arith.constant 0 : i32
    %c0_i32_0 = arith.constant 0 : i32
    %c0_i32_1 = arith.constant 0 : i32
    return %c0_i32, %c0_i32_0 : i32, i32
  }
  func.func @transform_7(%arg0: i32) -> (i32, i32) {
    %c0_i32 = arith.constant 0 : i32
    %c0_i32_0 = arith.constant 0 : i32
    %c0_i32_1 = arith.constant 0 : i32
    return %c0_i32, %c0_i32_0 : i32, i32
  }
  func.func @transform_8(%arg0: i32) -> (i32, i32) {
    %c0_i32 = arith.constant 0 : i32
    %c0_i32_0 = arith.constant 0 : i32
    %c0_i32_1 = arith.constant 0 : i32
    return %c0_i32, %c0_i32_0 : i32, i32
  }
  func.func @transform_9(%arg0: i32) -> (i32, i32) {
    %c0_i32 = arith.constant 0 : i32
    %c0_i32_0 = arith.constant 0 : i32
    return %arg0, %c0_i32 : i32, i32
  }
}

</mosaic_0001>

<bundles_post_ra>
// kernel: tpu_custom_call.1
= control target key start
LH: loop header
LB: loop body
LE: loop exit
PB: predicated region body
PF: predicated region fallthrough
CT: control target
= control target key end

     0   :  { %14 = vsyncpa [#allocation3], 0  ;;  %s1244_s0 = inlined_call_operand.hbm [shape: f32[8,32], index: 0, kind: input, shape index: {}]   ;;  %s1245_s1 = inlined_call_operand.hbm [shape: f32[32,128], index: 1, kind: input, shape index: {}]   ;;  %s1246_s2 = inlined_call_operand.vmem [shape: f32[1,128], index: 2, kind: input, shape index: {}]   ;;  %s1247_s3 = inlined_call_operand.hbm [shape: f32[128,128], index: 3, kind: input, shape index: {}]   ;;  %s1248_s4 = inlined_call_operand.vmem [shape: f32[1,128], index: 4, kind: input, shape index: {}]   ;;  %s1249_s5 = inlined_call_operand.hbm [shape: f32[128,128], index: 5, kind: input, shape index: {}]   ;;  %s1250_s6 = inlined_call_operand.vmem [shape: f32[1,128], index: 6, kind: input, shape index: {}]   ;;  %s1251_s7 = inlined_call_operand.hbm [shape: f32[128,128], index: 7, kind: input, shape index: {}]   ;;  %s1252_s8 = inlined_call_operand.vmem [shape: f32[1,128], index: 8, kind: input, shape index: {}]   ;;  %s1253_s9 = inlined_call_operand.hbm [shape: f32[8,128], index: 9, kind: output, shape index: {}]  }
   0x1   :  { %15 = vsyncpa [#allocation6], 0 }
   0x2   :  { %16 = vsyncpa [#allocation9], 0 }
   0x3   :  { %17 = vsyncpa [#allocation4], 0  ;;  %s1043_s30 = smov [#allocation5]   ;;  %s903_s13 = scalar_lea.hbm %s1245_s1, 512 }
   0x4   :  { %s33_s10 = sshll.u32 %s1043_s30, 4  ;;  %p904_p0 = scmp.ne.s32.totalorder %s1245_s1, %s903_s13  ;;  %s34_s10 = int_to_ptr.vmem [resolvable:$true] %s33_s10 }
   0x5   :  { %p907_p1 = scmp.lt.u32.totalorder %s903_s13, %s1245_s1 }
   0x7   :  { %p909_p2 = pnand %p907_p1, %p904_p0 }
   0x9   :  { %912 = shalt.err (!%p909_p2)
}
   0xa   :  { %s913_s18 = scalar_lea.vmem %s34_s10, 512  ;;  %p918_p4 = scmp.lt.s32.totalorder %s34_s10, %s34_s10 }
   0xb   :  { %p914_p3 = scmp.ne.s32.totalorder %s34_s10, %s913_s18  ;;  %p919_p5 = scmp.lt.s32.totalorder %s913_s18, %s913_s18 }
   0xd   :  { %p920_p6 = por %p919_p5, %p918_p4 }
   0xf   :  { %p921_p7 = pnand %p920_p6, %p914_p3 }
  0x11   :  { %924 = shalt.err (!%p921_p7)
}
  0x12   :  { %s1044_s19 = smov 128   ;;  %s1045_s20 = smov 8  }
  0x13   :  { %39 = dma.hbm_to_vmem [thread:$0]  %s1245_s1, 512, %s34_s10, [#allocation6], %s1044_s19, %s1044_s19, %s1045_s20  }
  0x14   :  { %s1046_s23 = smov [#allocation8]   ;;  %s1047_s25 = smov [#allocation2]  }
  0x15   :  { %s61_s24 = sshll.u32 %s1046_s23, 4  ;;  %s24_s26 = sshll.u32 %s1047_s25, 4  ;;  %s62_s24 = int_to_ptr.vmem [resolvable:$true] %s61_s24  ;;  %s25_s26 = int_to_ptr.vmem [resolvable:$true] %s24_s26 }
  0x16   :  { %s925_s29 = scalar_lea.hbm %s1249_s5, 2048 }
  0x17   :  { %p926_p8 = scmp.ne.s32.totalorder %s1249_s5, %s925_s29  ;;  %p929_p9 = scmp.lt.u32.totalorder %s925_s29, %s1249_s5 }
  0x19   :  { %p931_p10 = pnand %p929_p9, %p926_p8 }
  0x1b   :  { %934 = shalt.err (!%p931_p10)
}
  0x1c   :  { %s935_s1 = scalar_lea.vmem %s62_s24, 2048  ;;  %p940_p12 = scmp.lt.s32.totalorder %s62_s24, %s62_s24 }
  0x1d   :  { %p936_p11 = scmp.ne.s32.totalorder %s62_s24, %s935_s1  ;;  %p941_p13 = scmp.lt.s32.totalorder %s935_s1, %s935_s1 }
  0x1f   :  { %p942_p0 = por %p941_p13, %p940_p12 }
  0x21   :  { %p943_p1 = pnand %p942_p0, %p936_p11 }
  0x23   :  { %946 = shalt.err (!%p943_p1)
}
  0x24   :  { %67 = dma.hbm_to_vmem [thread:$0]  %s1249_s5, 2048, %s62_s24, [#allocation9], %s1044_s19, %s1044_s19, %s1045_s20  }
  0x25   :  { %s947_s17 = scalar_lea.hbm %s1244_s0, 128 }
  0x26   :  { %p948_p2 = scmp.ne.s32.totalorder %s1244_s0, %s947_s17  ;;  %p951_p3 = scmp.lt.u32.totalorder %s947_s17, %s1244_s0 }
  0x28   :  { %p953_p4 = pnand %p951_p3, %p948_p2 }
  0x2a   :  { %956 = shalt.err (!%p953_p4)
}
  0x2b   :  { %s957_s25 = scalar_lea.vmem %s25_s26, 128  ;;  %p962_p6 = scmp.lt.s32.totalorder %s25_s26, %s25_s26 }
  0x2c   :  { %p958_p5 = scmp.ne.s32.totalorder %s25_s26, %s957_s25  ;;  %p963_p7 = scmp.lt.s32.totalorder %s957_s25, %s957_s25 }
  0x2e   :  { %p964_p8 = por %p963_p7, %p962_p6 }
  0x30   :  { %p965_p9 = pnand %p964_p8, %p958_p5 }
  0x32   :  { %968 = shalt.err (!%p965_p9)
}
  0x33   :  { %27 = dma.hbm_to_vmem [thread:$0]  %s1244_s0, 128, %s25_s26, [#allocation3]  }
  0x34   :  { %s1048_s27 = smov [#allocation7]   ;;  %s1049_s29 = smov [#allocation10]  }
  0x35   :  { %s47_s28 = sshll.u32 %s1048_s27, 4  ;;  %s75_s30 = sshll.u32 %s1049_s29, 4  ;;  %s48_s28 = int_to_ptr.vmem [resolvable:$true] %s47_s28  ;;  %s76_s30 = int_to_ptr.vmem [resolvable:$true] %s75_s30 }
  0x36   :  { %s969_s13 = scalar_lea.hbm %s1247_s3, 2048 }
  0x37   :  { %p970_p10 = scmp.ne.s32.totalorder %s1247_s3, %s969_s13  ;;  %p973_p11 = scmp.lt.u32.totalorder %s969_s13, %s1247_s3 }
  0x39   :  { %p975_p12 = pnand %p973_p11, %p970_p10 }
  0x3b   :  { %978 = shalt.err (!%p975_p12)
}
  0x3c   :  { %s979_s0 = scalar_lea.vmem %s48_s28, 2048  ;;  %p984_p0 = scmp.lt.s32.totalorder %s48_s28, %s48_s28 }
  0x3d   :  { %p980_p13 = scmp.ne.s32.totalorder %s48_s28, %s979_s0  ;;  %p985_p1 = scmp.lt.s32.totalorder %s979_s0, %s979_s0 }
  0x3f   :  { %p986_p2 = por %p985_p1, %p984_p0 }
  0x41   :  { %p987_p3 = pnand %p986_p2, %p980_p13 }
  0x43   :  { %990 = shalt.err (!%p987_p3)
}
  0x44   :  { %53 = dma.hbm_to_vmem [thread:$0]  %s1247_s3, 2048, %s48_s28, [#allocation6], %s1044_s19, %s1044_s19, %s1045_s20  }
  0x45   :  { %s991_s21 = scalar_lea.hbm %s1251_s7, 2048 }
  0x46   :  { %p992_p4 = scmp.ne.s32.totalorder %s1251_s7, %s991_s21  ;;  %p995_p5 = scmp.lt.u32.totalorder %s991_s21, %s1251_s7 }
  0x48   :  { %p997_p6 = pnand %p995_p5, %p992_p4 }
  0x4a   :  { %1000 = shalt.err (!%p997_p6)
}
  0x4b   :  { %s1001_s24 = scalar_lea.vmem %s76_s30, 2048  ;;  %p1006_p8 = scmp.lt.s32.totalorder %s76_s30, %s76_s30 }
  0x4c   :  { %p1002_p7 = scmp.ne.s32.totalorder %s76_s30, %s1001_s24  ;;  %p1007_p9 = scmp.lt.s32.totalorder %s1001_s24, %s1001_s24 }
  0x4e   :  { %p1008_p10 = por %p1007_p9, %p1006_p8 }
  0x50   :  { %p1009_p11 = pnand %p1008_p10, %p1002_p7 }
  0x52   :  { %1012 = shalt.err (!%p1009_p11)
}
  0x53   :  { %81 = dma.hbm_to_vmem [thread:$0]  %s1251_s7, 2048, %s76_s30, [#allocation9], %s1044_s19, %s1044_s19, %s1045_s20  }
  0x54   :  { %1035 = dma.done.wait [#allocation3], 128  }
  0x55   :  { %1036 = vsyncadd [#allocation3], 4294967168 }
  0x56   :  { %1037 = dma.done.wait [#allocation6], 2560  }
  0x57   :  { %1038 = vsyncadd [#allocation6], 4294964736 }
  0x58   :  { %1039 = dma.done.wait [#allocation9], 4096  }
  0x59   :  { %1040 = vsyncadd [#allocation9], 4294963200  ;;  %v1050_v0 = vmov 0.0|0.0   ;;  %vm1051_vm0 = vmmov 0   ;;  %v1052_v1 = vmov 0.0   ;;  %v100_v2 = vld [vmem:[#allocation5] sm:$0xff] }
  0x5a   :  { %784 = vmatprep.subr.bf16.mxu0 %v1050_v0  ;;  %641 = vmatprep.mubr.msk.f32.mxu0 %vm1051_vm0, %v1052_v1  ;;  %v101_v3 = vld [vmem:[#allocation5 + $0x8] sm:$0xff]  ;;  %v102_v4 = vld [vmem:[#allocation5 + $0x10] sm:$0xff]  ;;  %v103_v6 = vld [vmem:[#allocation5 + $0x18] sm:$0xff]  ;;  %vm111_vm1 = vcmask 261120   ;;  %s1053_s11 = smov [#allocation11]  }
  0x5b   :  { %790 = vmatprep.subr.bf16.mxu1 %v1050_v0  ;;  %676 = vmatprep.mubr.msk.f32.mxu1 %vm1051_vm0, %v1052_v1  ;;  %v785_v5 = vpack.c.bf16 %v101_v3, %v100_v2  ;;  %v186_v7 = vld [vmem:[#allocation7] sm:$0xff]  ;;  %v187_v8 = vld [vmem:[#allocation7 + $0x8] sm:$0xff]  ;;  %v188_v9 = vld [vmem:[#allocation7 + $0x10] sm:$0xff]  ;;  %v788_v11 = vpack.c.bf16 %v103_v6, %v102_v4  ;;  %s544_s12 = sshll.u32 %s1053_s11, 4  ;;  %s545_s12 = int_to_ptr.vmem [resolvable:$true] %s544_s12 }
  0x5c   :  { %v189_v10 = vld [vmem:[#allocation7 + $0x18] sm:$0xff]  ;;  %v791_v12 = vpack.c.bf16 %v187_v8, %v186_v7  ;;  %v190_v14 = vld [vmem:[#allocation7 + $0x20] sm:$0xff]  ;;  %v191_v15 = vld [vmem:[#allocation7 + $0x28] sm:$0xff]  ;;  %s1013_s13 = scalar_lea.vmem %s545_s12, 128  ;;  %p1018_p13 = scmp.lt.s32.totalorder %s545_s12, %s545_s12 }
  0x5d   :  { %786 = vmatpush3.bf16.msra.mxu0 %v785_v5  ;;  %v794_v13 = vpack.c.bf16 %v189_v10, %v188_v9  ;;  %v99_v16 = vld [vmem:[#allocation2] sm:$0xff]  ;;  %v797_v17 = vpack.c.bf16 %v191_v15, %v190_v14  ;;  %v192_v18 = vld [vmem:[#allocation7 + $0x30] sm:$0xff]  ;;  %v194_v21 = vld [vmem:[#allocation7 + $0x40] sm:$0xff]  ;;  %p1014_p12 = scmp.ne.s32.totalorder %s545_s12, %s1013_s13  ;;  %p1019_p0 = scmp.lt.s32.totalorder %s1013_s13, %s1013_s13 }
  0x5e   :  { %787 = vmatprep.subr.bf16.mxu0 %v1050_v0  ;;  %792 = vmatpush3.bf16.msra.mxu1 %v791_v12  ;;  %v193_v19 = vld [vmem:[#allocation7 + $0x38] sm:$0xff]  ;;  %v195_v22 = vld [vmem:[#allocation7 + $0x48] sm:$0xff]  ;;  %v196_v24 = vld [vmem:[#allocation7 + $0x50] sm:$0xff] }
  0x5f   :  { %793 = vmatprep.subr.bf16.mxu1 %v1050_v0  ;;  %v800_v20 = vpack.c.bf16 %v193_v19, %v192_v18  ;;  %v803_v23 = vpack.c.bf16 %v195_v22, %v194_v21  ;;  %v197_v25 = vld [vmem:[#allocation7 + $0x58] sm:$0xff]  ;;  %v198_v27 = vld [vmem:[#allocation7 + $0x60] sm:$0xff]  ;;  %v199_v28 = vld [vmem:[#allocation7 + $0x68] sm:$0xff]  ;;  %p1020_p1 = por %p1019_p0, %p1018_p13 }
  0x60   :  { %v806_v26 = vpack.c.bf16 %v197_v25, %v196_v24  ;;  %v809_v29 = vpack.c.bf16 %v199_v28, %v198_v27  ;;  %v200_v30 = vld [vmem:[#allocation7 + $0x70] sm:$0xff]  ;;  %v201_v31 = vld [vmem:[#allocation7 + $0x78] sm:$0xff]  ;;  %v351_v38 = vld [vmem:[#allocation8] sm:$0xff] }
  0x61   :  { %789 = vmatpush3.bf16.msra.mxu0 %v788_v11  ;;  %v812_v32 = vpack.c.bf16 %v201_v31, %v200_v30  ;;  %v555_v33 = vld [vmem:[%s1246_s2] ss:$0 sm:$0xff]  ;;  %v352_v39 = vld [vmem:[#allocation8 + $0x8] sm:$0xff]  ;;  %v353_v40 = vld [vmem:[#allocation8 + $0x10] sm:$0xff]  ;;  %p1021_p2 = pnand %p1020_p1, %p1014_p12 }
  0x62   :  { %814 = vmatprep.subr.bf16.mxu0 %v1050_v0  ;;  %795 = vmatpush3.bf16.msra.mxu1 %v794_v13  ;;  %v839_v41 = vpack.c.bf16 %v352_v39, %v351_v38  ;;  %v354_v42 = vld [vmem:[#allocation8 + $0x18] sm:$0xff]  ;;  %v355_v44 = vld [vmem:[#allocation8 + $0x20] sm:$0xff]  ;;  %v356_v45 = vld [vmem:[#allocation8 + $0x28] sm:$0xff] }
  0x63   :  { %796 = vmatprep.subr.bf16.mxu1 %v1050_v0  ;;  %v842_v43 = vpack.c.bf16 %v354_v42, %v353_v40  ;;  %v845_v46 = vpack.c.bf16 %v356_v45, %v355_v44  ;;  %v357_v47 = vld [vmem:[#allocation8 + $0x30] sm:$0xff]  ;;  %v358_v48 = vld [vmem:[#allocation8 + $0x38] sm:$0xff]  ;;  %v359_v50 = vld [vmem:[#allocation8 + $0x40] sm:$0xff] }
  0x64   :  { %642 = vmatmul.mubr.msk.f32.vlgmr.msra.gmra.mrb[0].mxu0 %vm111_vm1, %v99_v16  ;;  %v848_v49 = vpack.c.bf16 %v358_v48, %v357_v47  ;;  %v360_v51 = vld [vmem:[#allocation8 + $0x48] sm:$0xff]  ;;  %v557_v53 = vld [vmem:[%s1248_s4] ss:$0 sm:$0xff]  ;;  %v361_v58 = vld [vmem:[#allocation8 + $0x50] sm:$0xff] }
  0x65   :  { %816 = vmatpush3.bf16.msra.mxu0 %v791_v12  ;;  %711 = vmatprep.mubr.msk.f32.mxu0 %vm1051_vm0, %v1052_v1  ;;  %v851_v52 = vpack.c.bf16 %v360_v51, %v359_v50  ;;  %v362_v59 = vld [vmem:[#allocation8 + $0x58] sm:$0xff]  ;;  %v363_v61 = vld [vmem:[#allocation8 + $0x60] sm:$0xff]  ;;  %v364_v62 = vld [vmem:[#allocation8 + $0x68] sm:$0xff] }
  0x66   :  { %817 = vmatprep.subr.bf16.mxu0 %v1050_v0  ;;  %798 = vmatpush3.bf16.msra.mxu1 %v797_v17  ;;  %v854_v60 = vpack.c.bf16 %v362_v59, %v361_v58  ;;  %v857_v63 = vpack.c.bf16 %v364_v62, %v363_v61  ;;  %v365_v2 = vld [vmem:[#allocation8 + $0x70] sm:$0xff]  ;;  %v366_v3 = vld [vmem:[#allocation8 + $0x78] sm:$0xff]  ;;  %v444_v5 = vld [vmem:[#allocation10] sm:$0xff] }
  0x67   :  { %799 = vmatprep.subr.bf16.mxu1 %v1050_v0  ;;  %v860_v4 = vpack.c.bf16 %v366_v3, %v365_v2  ;;  %v445_v6 = vld [vmem:[#allocation10 + $0x8] sm:$0xff]  ;;  %v446_v7 = vld [vmem:[#allocation10 + $0x10] sm:$0xff]  ;;  %v447_v8 = vld [vmem:[#allocation10 + $0x18] sm:$0xff] }
  0x68   :  { %v866_v9 = vpack.c.bf16 %v447_v8, %v446_v7  ;;  %v448_v10 = vld [vmem:[#allocation10 + $0x20] sm:$0xff]  ;;  %v449_v11 = vld [vmem:[#allocation10 + $0x28] sm:$0xff]  ;;  %v451_v14 = vld [vmem:[#allocation10 + $0x38] sm:$0xff] }
  0x69   :  { %819 = vmatpush3.bf16.msra.mxu0 %v794_v13  ;;  %v869_v12 = vpack.c.bf16 %v449_v11, %v448_v10  ;;  %v450_v13 = vld [vmem:[#allocation10 + $0x30] sm:$0xff]  ;;  %v452_v16 = vld [vmem:[#allocation10 + $0x40] sm:$0xff]  ;;  %v459_v30 = vld [vmem:[#allocation10 + $0x78] sm:$0xff] }
  0x6a   :  { %820 = vmatprep.subr.bf16.mxu0 %v1050_v0  ;;  %801 = vmatpush3.bf16.msra.mxu1 %v800_v20  ;;  %v872_v15 = vpack.c.bf16 %v451_v14, %v450_v13  ;;  %v454_v19 = vld [vmem:[#allocation10 + $0x50] sm:$0xff]  ;;  %v456_v22 = vld [vmem:[#allocation10 + $0x60] sm:$0xff] }
  0x6b   :  { %802 = vmatprep.subr.bf16.mxu1 %v1050_v0 }
  0x6d   :  { %822 = vmatpush3.bf16.msra.mxu0 %v797_v17  ;;  %v453_v17 = vld [vmem:[#allocation10 + $0x48] sm:$0xff] }
  0x6e   :  { %823 = vmatprep.subr.bf16.mxu0 %v1050_v0  ;;  %804 = vmatpush3.bf16.msra.mxu1 %v803_v23  ;;  %v875_v18 = vpack.c.bf16 %v453_v17, %v452_v16 }
  0x6f   :  { %805 = vmatprep.subr.bf16.mxu1 %v1050_v0 }
  0x71   :  { %825 = vmatpush3.bf16.msra.mxu0 %v800_v20  ;;  %v455_v20 = vld [vmem:[#allocation10 + $0x58] sm:$0xff] }
  0x72   :  { %826 = vmatprep.subr.bf16.mxu0 %v1050_v0  ;;  %807 = vmatpush3.bf16.msra.mxu1 %v806_v26  ;;  %v878_v21 = vpack.c.bf16 %v455_v20, %v454_v19 }
  0x73   :  { %808 = vmatprep.subr.bf16.mxu1 %v1050_v0 }
  0x75   :  { %828 = vmatpush3.bf16.msra.mxu0 %v803_v23  ;;  %v457_v23 = vld [vmem:[#allocation10 + $0x68] sm:$0xff] }
  0x76   :  { %829 = vmatprep.subr.bf16.mxu0 %v1050_v0  ;;  %810 = vmatpush3.bf16.msra.mxu1 %v809_v29  ;;  %v881_v24 = vpack.c.bf16 %v457_v23, %v456_v22 }
  0x77   :  { %811 = vmatprep.subr.bf16.mxu1 %v1050_v0 }
  0x79   :  { %831 = vmatpush3.bf16.msra.mxu0 %v806_v26 }
  0x7a   :  { %832 = vmatprep.subr.bf16.mxu0 %v1050_v0  ;;  %813 = vmatpush3.bf16.msra.mxu1 %v812_v32 }
  0x7b   :  { %838 = vmatprep.subr.bf16.mxu1 %v1050_v0 }
  0x7d   :  { %834 = vmatpush3.bf16.msra.mxu0 %v809_v29  ;;  %v458_v29 = vld [vmem:[#allocation10 + $0x70] sm:$0xff] }
  0x7e   :  { %835 = vmatprep.subr.bf16.mxu0 %v1050_v0  ;;  %v884_v31 = vpack.c.bf16 %v459_v30, %v458_v29 }
  0x81   :  { %837 = vmatpush3.bf16.msra.mxu0 %v812_v32  ;;  %v558_v32 = vld [vmem:[%s1250_s6] ss:$0 sm:$0xff] }
  0x82   :  { %862 = vmatprep.subr.bf16.mxu0 %v1050_v0 }
 0x137   :  { %v181_v34 = vpop.f32.mrb[0].mxu0 }
 0x138   :  { %v182_v35 = vadd.f32 %v555_v33, %v181_v34  ;;  %v643_v36 = vpop.f32.mrb[1].mxu0 }
 0x13a   :  { %897 = vtanh.f32 %v182_v35 }
 0x144   :  { %v898_v37 = vpop.eup %897 }
 0x145   :  { %677 = vmatmul.mubr.f32.vlgmr.msra.gmra.mrb[0].mxu1 %v898_v37 }
 0x146   :  { %746 = vmatprep.mubr.msk.f32.mxu1 %vm1051_vm0, %v1052_v1  ;;  %840 = vmatpush3.bf16.msra.mxu1 %v839_v41 }
 0x147   :  { %841 = vmatprep.subr.bf16.mxu1 %v1050_v0 }
 0x14a   :  { %843 = vmatpush3.bf16.msra.mxu1 %v842_v43 }
 0x14b   :  { %844 = vmatprep.subr.bf16.mxu1 %v1050_v0 }
 0x14e   :  { %846 = vmatpush3.bf16.msra.mxu1 %v845_v46 }
 0x14f   :  { %847 = vmatprep.subr.bf16.mxu1 %v1050_v0 }
 0x152   :  { %849 = vmatpush3.bf16.msra.mxu1 %v848_v49 }
 0x153   :  { %850 = vmatprep.subr.bf16.mxu1 %v1050_v0 }
 0x156   :  { %852 = vmatpush3.bf16.msra.mxu1 %v851_v52 }
 0x157   :  { %853 = vmatprep.subr.bf16.mxu1 %v1050_v0 }
 0x15a   :  { %855 = vmatpush3.bf16.msra.mxu1 %v854_v60 }
 0x15b   :  { %856 = vmatprep.subr.bf16.mxu1 %v1050_v0 }
 0x15e   :  { %858 = vmatpush3.bf16.msra.mxu1 %v857_v63 }
 0x15f   :  { %859 = vmatprep.subr.bf16.mxu1 %v1050_v0 }
 0x162   :  { %861 = vmatpush3.bf16.msra.mxu1 %v860_v4 }
 0x218   :  { %v275_v54 = vpop.f32.mrb[0].mxu1 }
 0x219   :  { %v276_v55 = vadd.f32 %v557_v53, %v275_v54  ;;  %v678_v56 = vpop.f32.mrb[1].mxu1 }
 0x21b   :  { %899 = vtanh.f32 %v276_v55 }
 0x225   :  { %v900_v57 = vpop.eup %899 }
 0x226   :  { %712 = vmatmul.mubr.f32.vlgmr.msra.gmra.mrb[2].mxu0 %v900_v57 }
 0x227   :  { %781 = vmatprep.mubr.msk.f32.mxu0 %vm1051_vm0, %v1052_v1  ;;  %v863_v1 = vpack.c.bf16 %v445_v6, %v444_v5 }
 0x229   :  { %864 = vmatpush3.bf16.msra.mxu0 %v863_v1 }
 0x22a   :  { %865 = vmatprep.subr.bf16.mxu0 %v1050_v0 }
 0x22d   :  { %867 = vmatpush3.bf16.msra.mxu0 %v866_v9 }
 0x22e   :  { %868 = vmatprep.subr.bf16.mxu0 %v1050_v0 }
 0x231   :  { %870 = vmatpush3.bf16.msra.mxu0 %v869_v12 }
 0x232   :  { %871 = vmatprep.subr.bf16.mxu0 %v1050_v0 }
 0x235   :  { %873 = vmatpush3.bf16.msra.mxu0 %v872_v15 }
 0x236   :  { %874 = vmatprep.subr.bf16.mxu0 %v1050_v0 }
 0x239   :  { %876 = vmatpush3.bf16.msra.mxu0 %v875_v18 }
 0x23a   :  { %877 = vmatprep.subr.bf16.mxu0 %v1050_v0 }
 0x23d   :  { %879 = vmatpush3.bf16.msra.mxu0 %v878_v21 }
 0x23e   :  { %880 = vmatprep.subr.bf16.mxu0 %v1050_v0 }
 0x241   :  { %882 = vmatpush3.bf16.msra.mxu0 %v881_v24 }
 0x242   :  { %883 = vmatprep.subr.bf16.mxu0 %v1050_v0  ;;  %v559_v0 = vld [vmem:[%s1252_s8] ss:$0 sm:$0xff] }
 0x245   :  { %885 = vmatpush3.bf16.msra.mxu0 %v884_v31 }
 0x2f9   :  { %v346_v25 = vpop.f32.mrb[2].mxu0 }
 0x2fa   :  { %v347_v26 = vadd.f32 %v557_v53, %v346_v25  ;;  %v713_v27 = vpop.f32.mrb[3].mxu0 }
 0x2fc   :  { %901 = vtanh.f32 %v347_v26 }
 0x306   :  { %v902_v28 = vpop.eup %901 }
 0x307   :  { %747 = vmatmul.mubr.f32.vlgmr.msra.gmra.mrb[2].mxu1 %v902_v28 }
 0x3da   :  { %v440_v33 = vpop.f32.mrb[2].mxu1 }
 0x3db   :  { %v441_v34 = vadd.f32 %v558_v32, %v440_v33  ;;  %v748_v35 = vpop.f32.mrb[3].mxu1 }
 0x3dd   :  { %782 = vmatmul.mubr.f32.vlgmr.msra.gmra.mrb[4].mxu0 %v441_v34 }
 0x4b0   :  { %v533_v36 = vpop.f32.mrb[4].mxu0 }
 0x4b1   :  { %v534_v37 = vadd.f32 %v559_v0, %v533_v36  ;;  %v783_v38 = vpop.f32.mrb[5].mxu0 }
 0x4b3   :  { %537 = vst [vmem:[#allocation11] sm:$0xff] %v534_v37 }
 0x4b4   :  { %1024 = shalt.err (!%p1021_p2)
}
 0x4b5   :  { %s1025_s10 = scalar_lea.hbm %s1253_s9, 128 }
 0x4b6   :  { %p1026_p3 = scmp.ne.s32.totalorder %s1253_s9, %s1025_s10  ;;  %p1029_p4 = scmp.lt.u32.totalorder %s1025_s10, %s1253_s9 }
 0x4b8   :  { %p1031_p5 = pnand %p1029_p4, %p1026_p3 }
 0x4ba   :  { %1034 = shalt.err (!%p1031_p5)
}
 0x4bb   :  { %547 = dma.vmem_to_hbm [thread:$0]  %s545_s12, 128, %s1253_s9, [#allocation4]  }
 0x4bc   :  { %1041 = dma.done.wait [#allocation4], 128  }
 0x4bd   :  { %1042 = vsyncadd [#allocation4], 4294967168 }
 0x4be   :  { %551 = vsyncpa [#allocation3], 1 }
 0x4bf   :  { %552 = vsyncpa [#allocation6], 1 }
 0x4c0   :  { %553 = vsyncpa [#allocation9], 1 }
 0x4c1   :  { %554 = vsyncpa [#allocation4], 1 }

</bundles_post_ra>
